<compile_context>
chip_gen: v6e
topology: v6e:2x2x1
jax: 0.10.0
libtpu: 0.0.40
codegen_flags: <defaults>
</compile_context>

<pallas_src>
import functools

import numpy as np
import jax
import jax.numpy as jnp
from jax.experimental import pallas as pl
from jax.experimental.pallas import tpu as pltpu


def _round_up(x, m):
    return ((x + m - 1) // m) * m


def _sll_kernel(xy_ref, inc_ref, mask_ref, out_ref, spanned_acc, *,
                xl, yl, slr_width, slr_height, num_slrX, num_slrY, table):
    """Grid = (net_tiles [parallel], pin_tiles [arbitrary, reduction])."""
    k = pl.program_id(1)
    last_k = pl.num_programs(1) - 1
    p_tile = xy_ref.shape[1]
    n_tile = inc_ref.shape[1]

    @pl.when(k == 0)
    def _init():
        spanned_acc[...] = jnp.zeros_like(spanned_acc)
        out_ref[...] = jnp.zeros_like(out_ref)

    # Per-pin SLR id for this pin tile.
    x = xy_ref[0:1, :]                                            # (1, p_tile)
    y = xy_ref[1:2, :]                                            # (1, p_tile)
    sx = jnp.clip(jnp.floor((x - xl) / slr_width).astype(jnp.int32), 0, num_slrX - 1)
    sy = jnp.clip(jnp.floor((y - yl) / slr_height).astype(jnp.int32), 0, num_slrY - 1)
    slr_id = sx * num_slrY + sy                                   # values in [0, num_slr)

    # Full-sublane one-hot LHS: rows >= num_slr are always zero.
    sid_iota = jax.lax.broadcasted_iota(jnp.int32, (8, p_tile), 0)
    onehot = (slr_id == sid_iota).astype(inc_ref.dtype)           # (8, p_tile) bf16

    # Accumulate per-net spanned-SLR pin counts across pin tiles (MXU, f32 accum).
    spanned_acc[...] += jnp.dot(onehot, inc_ref[...],
                                preferred_element_type=jnp.float32)

    @pl.when(k == last_k)
    def _finalize():
        bits = (spanned_acc[...] > 0.5).astype(jnp.int32)         # (8, n_tile) 0/1
        pw = jnp.left_shift(1, jax.lax.broadcasted_iota(jnp.int32, (8, 1), 0))
        bitmask = jnp.sum(bits * pw, axis=0, keepdims=True)       # (1, n_tile)

        # Table lookup with baked constants; zero entries skipped.
        sll = jnp.zeros((1, n_tile), jnp.int32)
        for code, cnt in enumerate(table):
            if cnt != 0:
                sll = sll + jnp.where(bitmask == code, jnp.int32(cnt), 0)

        partial = jnp.sum(sll * mask_ref[...])                    # int32 scalar
        row = jax.lax.broadcasted_iota(jnp.int32, (8, 128), 0)
        col = jax.lax.broadcasted_iota(jnp.int32, (8, 128), 1)
        out_ref[...] = jnp.where((row == 0) & (col == 0), partial, 0)


def build_sll(flat_netpin, netpin_start, net_weights, net_mask, sll_counts_table,
              xl, yl, slr_width, slr_height, num_slrX, num_slrY, num_pins,
              *, p_tile=1024, n_tile=2048):
    """One-time setup over the static connectivity; returns jitted forward(pos)->int32.

    pos: flat (2*num_pins,) array [x_0..x_{P-1}, y_0..y_{P-1}].
    """
    del net_weights  # TODO(synk): not applied (reference returns unweighted counts)

    flat_netpin = np.asarray(flat_netpin, np.int64)
    netpin_start = np.asarray(netpin_start, np.int64)
    net_mask = np.asarray(net_mask, np.int32)
    table = tuple(int(v) for v in np.asarray(sll_counts_table).reshape(-1))

    num_nets = int(netpin_start.shape[0]) - 1
    num_slr = int(num_slrX) * int(num_slrY)
    assert num_slr <= 8 and len(table) == (1 << num_slr), \
        "unsupported SLR topology for this kernel"

    # Tile sizes: clamp to the (padded) problem size; keep lane dim multiples of 128.
    p_tile = min(int(p_tile), _round_up(max(num_pins, 1), 128))
    n_tile = min(int(n_tile), _round_up(max(num_nets, 1), 128))
    p_pad = _round_up(max(num_pins, 1), p_tile)
    n_pad = _round_up(max(num_nets, 1), n_tile)

    # Dense 0/1 pin->net incidence, built ONCE (vectorized), stored as bf16.
    degrees = netpin_start[1:] - netpin_start[:-1]
    net_of_pin = np.repeat(np.arange(num_nets, dtype=np.int64), degrees)
    inc_np = np.zeros((p_pad, n_pad), np.float32)
    inc_np[flat_netpin, net_of_pin] = 1.0
    inc = jnp.asarray(inc_np, jnp.bfloat16)

    mask_np = np.zeros((1, n_pad), np.int32)
    mask_np[0, :num_nets] = net_mask
    mask = jnp.asarray(mask_np)

    num_n_tiles = n_pad // n_tile
    num_p_tiles = p_pad // p_tile

    kernel = functools.partial(
        _sll_kernel,
        xl=float(xl), yl=float(yl),
        slr_width=float(slr_width), slr_height=float(slr_height),
        num_slrX=int(num_slrX), num_slrY=int(num_slrY), table=table)

    grid_spec = pltpu.PrefetchScalarGridSpec(
        num_scalar_prefetch=0,
        grid=(num_n_tiles, num_p_tiles),           # nets (parallel), pins (reduction, last)
        in_specs=[
            pl.BlockSpec((2, p_tile), lambda j, k: (0, k)),        # xy
            pl.BlockSpec((p_tile, n_tile), lambda j, k: (k, j)),   # incidence (bf16)
            pl.BlockSpec((1, n_tile), lambda j, k: (0, j)),        # net mask
        ],
        out_specs=pl.BlockSpec((8, 128), lambda j, k: (j, 0)),     # per-net-tile partial
        scratch_shapes=[pltpu.VMEM((8, n_tile), jnp.float32)],     # spanned accumulator
    )

    call = pl.pallas_call(
        kernel,
        out_shape=jax.ShapeDtypeStruct((num_n_tiles * 8, 128), jnp.int32),
        grid_spec=grid_spec,
        compiler_params=pltpu.CompilerParams(
            dimension_semantics=("parallel", "arbitrary")),
    )

    @jax.jit
    def forward(pos):
        pos = jnp.asarray(pos, jnp.float32)
        x = jnp.pad(pos[:num_pins], (0, p_pad - num_pins), constant_values=float(xl))
        y = jnp.pad(pos[num_pins:2 * num_pins], (0, p_pad - num_pins),
                    constant_values=float(yl))
        xy = jnp.stack([x, y])                     # (2, p_pad)
        partials = call(xy, inc, mask)             # nonzeros only at [8*j, 0]
        return jnp.sum(partials)

    return forward


def sll_reference(pos, flat_netpin, netpin_start, net_mask, table,
                  xl, yl, sw, sh, nx, ny):
    pos = np.asarray(pos)
    num_pins = pos.shape[0] // 2
    px, py = pos[:num_pins], pos[num_pins:]
    fnp, nps = np.asarray(flat_netpin), np.asarray(netpin_start)
    total = 0
    for n in range(len(nps) - 1):
        if not int(net_mask[n]):
            continue
        bm = 0
        for j in range(int(nps[n]), int(nps[n + 1])):
            p = int(fnp[j])
            sx = min(max(int(np.floor((px[p] - xl) / sw)), 0), nx - 1)
            sy = min(max(int(np.floor((py[p] - yl) / sh)), 0), ny - 1)
            bm |= 1 << (sx * ny + sy)
        total += int(table[bm])
    return total


if __name__ == "__main__":
    key = jax.random.PRNGKey(0)
    k_deg, k_fnp, k_mask, k_x, k_y = jax.random.split(key, 5)

    # SLR topology 2x2 (table from the module __init__)
    num_slrX, num_slrY = 2, 2
    xl, yl = 0.0, 0.0
    slr_width, slr_height = 8.0, 8.0
    sll_counts_table = np.array([0, 0, 0, 1, 0, 1, 2, 2, 0, 2, 1, 2, 1, 2, 2, 3],
                                dtype=np.int32)

    num_pins, num_nets = 300, 260
    degrees = np.asarray(jax.random.randint(k_deg, (num_nets,), 2, 7))
    netpin_start = np.concatenate([[0], np.cumsum(degrees)]).astype(np.int32)
    flat_netpin = np.asarray(
        jax.random.randint(k_fnp, (int(netpin_start[-1]),), 0, num_pins)).astype(np.int32)
    net_weights = np.ones((num_nets,), np.float32)   # unused (see TODO above)
    net_mask = np.asarray(jax.random.uniform(k_mask, (num_nets,)) > 0.2).astype(np.int32)

    x = jax.random.uniform(k_x, (num_pins,), jnp.float32, 0.0, 16.0)
    y = jax.random.uniform(k_y, (num_pins,), jnp.float32, 0.0, 16.0)
    pos = jnp.concatenate([x, y])                    # [x..., y...]

    # Small tiles here so the demo exercises a multi-tile (3 net-tiles x 3 pin-tiles)
    # grid; production defaults are p_tile=1024, n_tile=2048 (bf16 inc tile = 4 MiB).
    sll_fn = build_sll(flat_netpin, netpin_start, net_weights, net_mask,
                       sll_counts_table, xl, yl, slr_width, slr_height,
                       num_slrX, num_slrY, num_pins, p_tile=128, n_tile=128)

    result = sll_fn(pos)
    jax.block_until_ready(result)

    expected = sll_reference(pos, flat_netpin, netpin_start, net_mask, sll_counts_table,
                             xl, yl, slr_width, slr_height, num_slrX, num_slrY)
    assert int(result) == expected, (int(result), expected)
    print("KERNEL_OK")
</pallas_src>

<mosaic_0001>
module attributes {stable_mosaic.version = 11 : i64} {
  func.func @_sll_kernel(%arg0: i32, %arg1: i32, %arg2: memref<2x128xf32, #tpu.memory_space<vmem>>, %arg3: memref<128x128xbf16, #tpu.memory_space<vmem>>, %arg4: memref<1x128xi32, #tpu.memory_space<vmem>>, %arg5: memref<8x128xi32, #tpu.memory_space<vmem>>, %arg6: memref<8x128xf32, #tpu.memory_space<vmem>>) attributes {dimension_semantics = [#tpu.dimension_semantics<parallel>, #tpu.dimension_semantics<arbitrary>], iteration_bounds = array<i64: 3, 3>, scalar_prefetch = 0 : i64, scratch_operands = 1 : i64, tpu.core_type = #tpu.core_type<tc>, window_params = [{transform_indices = @transform_0, window_bounds = array<i64: 2, 128>}, {transform_indices = @transform_1, window_bounds = array<i64: 128, 128>}, {transform_indices = @transform_2, window_bounds = array<i64: 1, 128>}, {transform_indices = @transform_3, window_bounds = array<i64: 8, 128>}]} {
    %c0_i32 = arith.constant 0 : i32
    %0 = arith.cmpi eq, %arg1, %c0_i32 : i32
    %1 = arith.extui %0 : i1 to i32
    %c0_i32_0 = arith.constant 0 : i32
    %2 = arith.cmpi ne, %1, %c0_i32_0 : i32
    scf.if %2 {
      %cst_18 = arith.constant 0.000000e+00 : f32
      %42 = vector.broadcast %cst_18 : f32 to vector<8x128xf32>
      %c0_19 = arith.constant 0 : index
      %c0_20 = arith.constant 0 : index
      %43 = vector.load %arg6[%c0_19, %c0_20] : memref<8x128xf32, #tpu.memory_space<vmem>>, vector<8x128xf32>
      tpu.vector_store %arg6[%c0_19, %c0_20], %42 {strides = array<i32>} : memref<8x128xf32, #tpu.memory_space<vmem>>, vector<8x128xf32>,
      %c0_i32_21 = arith.constant 0 : i32
      %44 = vector.broadcast %c0_i32_21 : i32 to vector<8x128xi32>
      %c0_22 = arith.constant 0 : index
      %c0_23 = arith.constant 0 : index
      %45 = vector.load %arg5[%c0_22, %c0_23] : memref<8x128xi32, #tpu.memory_space<vmem>>, vector<8x128xi32>
      tpu.vector_store %arg5[%c0_22, %c0_23], %44 {strides = array<i32>} : memref<8x128xi32, #tpu.memory_space<vmem>>, vector<8x128xi32>,
    } else {
    }
    %c0 = arith.constant 0 : index
    %c0_1 = arith.constant 0 : index
    %3 = vector.load %arg2[%c0, %c0_1] : memref<2x128xf32, #tpu.memory_space<vmem>>, vector<1x128xf32>
    %c1 = arith.constant 1 : index
    %c0_2 = arith.constant 0 : index
    %4 = vector.load %arg2[%c1, %c0_2] : memref<2x128xf32, #tpu.memory_space<vmem>>, vector<1x128xf32>
    %cst = arith.constant 0.000000e+00 : f32
    %5 = vector.broadcast %cst : f32 to vector<1x128xf32>
    %6 = arith.subf %3, %5 : vector<1x128xf32>
    %cst_3 = arith.constant 8.000000e+00 : f32
    %7 = vector.broadcast %cst_3 : f32 to vector<1x128xf32>
    %8 = arith.divf %6, %7 : vector<1x128xf32>
    %9 = math.floor %8 : vector<1x128xf32>
    %10 = arith.fptosi %9 : vector<1x128xf32> to vector<1x128xi32>
    %c0_i32_4 = arith.constant 0 : i32
    %c1_i32 = arith.constant 1 : i32
    %11 = vector.broadcast %c0_i32_4 : i32 to vector<1x128xi32>
    %12 = arith.maxsi %11, %10 : vector<1x128xi32>
    %13 = vector.broadcast %c1_i32 : i32 to vector<1x128xi32>
    %14 = arith.minsi %13, %12 : vector<1x128xi32>
    %cst_5 = arith.constant 0.000000e+00 : f32
    %15 = vector.broadcast %cst_5 : f32 to vector<1x128xf32>
    %16 = arith.subf %4, %15 : vector<1x128xf32>
    %cst_6 = arith.constant 8.000000e+00 : f32
    %17 = vector.broadcast %cst_6 : f32 to vector<1x128xf32>
    %18 = arith.divf %16, %17 : vector<1x128xf32>
    %19 = math.floor %18 : vector<1x128xf32>
    %20 = arith.fptosi %19 : vector<1x128xf32> to vector<1x128xi32>
    %c0_i32_7 = arith.constant 0 : i32
    %c1_i32_8 = arith.constant 1 : i32
    %21 = vector.broadcast %c0_i32_7 : i32 to vector<1x128xi32>
    %22 = arith.maxsi %21, %20 : vector<1x128xi32>
    %23 = vector.broadcast %c1_i32_8 : i32 to vector<1x128xi32>
    %24 = arith.minsi %23, %22 : vector<1x128xi32>
    %c2_i32 = arith.constant 2 : i32
    %25 = vector.broadcast %c2_i32 : i32 to vector<1x128xi32>
    %26 = arith.muli %14, %25 : vector<1x128xi32>
    %27 = arith.addi %26, %24 : vector<1x128xi32>
    %28 = tpu.iota {dimensions = array<i32: 0>} : vector<8x128xi32>
    %29 = vector.broadcast %27 : vector<1x128xi32> to vector<8x128xi32>
    %30 = arith.cmpi eq, %29, %28 : vector<8x128xi32>
    %31 = arith.extui %30 : vector<8x128xi1> to vector<8x128xi32>
    %32 = arith.sitofp %31 : vector<8x128xi32> to vector<8x128xf32>
    %33 = arith.truncf %32 : vector<8x128xf32> to vector<8x128xbf16>
    %c0_9 = arith.constant 0 : index
    %c0_10 = arith.constant 0 : index
    %34 = vector.load %arg6[%c0_9, %c0_10] : memref<8x128xf32, #tpu.memory_space<vmem>>, vector<8x128xf32>
    %c0_11 = arith.constant 0 : index
    %c0_12 = arith.constant 0 : index
    %35 = vector.load %arg3[%c0_11, %c0_12] : memref<128x128xbf16, #tpu.memory_space<vmem>>, vector<128x128xbf16>
    %cst_13 = arith.constant dense<0.000000e+00> : vector<8x128xf32>
    %36 = tpu.matmul %33, %35, %cst_13 {dimension_numbers = #tpu.dot_dimension_numbers<[1], [0], [0], [1], [0, 0, 1, 1], [], []>} : vector<8x128xbf16>, vector<128x128xbf16>, vector<8x128xf32> -> vector<8x128xf32>
    %37 = arith.addf %34, %36 : vector<8x128xf32>
    %c0_14 = arith.constant 0 : index
    %c0_15 = arith.constant 0 : index
    %38 = vector.load %arg6[%c0_14, %c0_15] : memref<8x128xf32, #tpu.memory_space<vmem>>, vector<8x128xf32>
    tpu.vector_store %arg6[%c0_14, %c0_15], %37 {strides = array<i32>} : memref<8x128xf32, #tpu.memory_space<vmem>>, vector<8x128xf32>,
    %c2_i32_16 = arith.constant 2 : i32
    %39 = arith.cmpi eq, %arg1, %c2_i32_16 : i32
    %40 = arith.extui %39 : i1 to i32
    %c0_i32_17 = arith.constant 0 : i32
    %41 = arith.cmpi ne, %40, %c0_i32_17 : i32
    scf.if %41 {
      %c0_18 = arith.constant 0 : index
      %c0_19 = arith.constant 0 : index
      %42 = vector.load %arg6[%c0_18, %c0_19] : memref<8x128xf32, #tpu.memory_space<vmem>>, vector<8x128xf32>
      %cst_20 = arith.constant 5.000000e-01 : f32
      %43 = vector.broadcast %cst_20 : f32 to vector<8x128xf32>
      %44 = arith.cmpf ogt, %42, %43 : vector<8x128xf32>
      %45 = arith.extui %44 : vector<8x128xi1> to vector<8x128xi32>
      %46 = tpu.iota {dimensions = array<i32: 0>} : vector<8x1xi32>
      %c1_i32_21 = arith.constant 1 : i32
      %47 = vector.broadcast %c1_i32_21 : i32 to vector<8x1xi32>
      %48 = arith.shli %47, %46 : vector<8x1xi32>
      %49 = vector.broadcast %48 : vector<8x1xi32> to vector<8x128xi32>
      %50 = arith.muli %45, %49 : vector<8x128xi32>
      %cst_22 = arith.constant dense<0> : vector<128xi32>
      %51 = vector.multi_reduction <add>, %50, %cst_22 [0] : vector<8x128xi32> to vector<128xi32>
      %52 = vector.shape_cast %51 : vector<128xi32> to vector<1x128xi32>
      %c0_i32_23 = arith.constant 0 : i32
      %53 = vector.broadcast %c0_i32_23 : i32 to vector<1x128xi32>
      %c3_i32 = arith.constant 3 : i32
      %54 = vector.broadcast %c3_i32 : i32 to vector<1x128xi32>
      %55 = arith.cmpi eq, %52, %54 : vector<1x128xi32>
      %c1_i32_24 = arith.constant 1 : i32
      %c0_i32_25 = arith.constant 0 : i32
      %56 = vector.broadcast %c1_i32_24 : i32 to vector<1x128xi32>
      %57 = vector.broadcast %c0_i32_25 : i32 to vector<1x128xi32>
      %58 = arith.select %55, %56, %57 : vector<1x128xi1>, vector<1x128xi32>
      %59 = arith.addi %53, %58 : vector<1x128xi32>
      %c5_i32 = arith.constant 5 : i32
      %60 = vector.broadcast %c5_i32 : i32 to vector<1x128xi32>
      %61 = arith.cmpi eq, %52, %60 : vector<1x128xi32>
      %c1_i32_26 = arith.constant 1 : i32
      %c0_i32_27 = arith.constant 0 : i32
      %62 = vector.broadcast %c1_i32_26 : i32 to vector<1x128xi32>
      %63 = vector.broadcast %c0_i32_27 : i32 to vector<1x128xi32>
      %64 = arith.select %61, %62, %63 : vector<1x128xi1>, vector<1x128xi32>
      %65 = arith.addi %59, %64 : vector<1x128xi32>
      %c6_i32 = arith.constant 6 : i32
      %66 = vector.broadcast %c6_i32 : i32 to vector<1x128xi32>
      %67 = arith.cmpi eq, %52, %66 : vector<1x128xi32>
      %c2_i32_28 = arith.constant 2 : i32
      %c0_i32_29 = arith.constant 0 : i32
      %68 = vector.broadcast %c2_i32_28 : i32 to vector<1x128xi32>
      %69 = vector.broadcast %c0_i32_29 : i32 to vector<1x128xi32>
      %70 = arith.select %67, %68, %69 : vector<1x128xi1>, vector<1x128xi32>
      %71 = arith.addi %65, %70 : vector<1x128xi32>
      %c7_i32 = arith.constant 7 : i32
      %72 = vector.broadcast %c7_i32 : i32 to vector<1x128xi32>
      %73 = arith.cmpi eq, %52, %72 : vector<1x128xi32>
      %c2_i32_30 = arith.constant 2 : i32
      %c0_i32_31 = arith.constant 0 : i32
      %74 = vector.broadcast %c2_i32_30 : i32 to vector<1x128xi32>
      %75 = vector.broadcast %c0_i32_31 : i32 to vector<1x128xi32>
      %76 = arith.select %73, %74, %75 : vector<1x128xi1>, vector<1x128xi32>
      %77 = arith.addi %71, %76 : vector<1x128xi32>
      %c9_i32 = arith.constant 9 : i32
      %78 = vector.broadcast %c9_i32 : i32 to vector<1x128xi32>
      %79 = arith.cmpi eq, %52, %78 : vector<1x128xi32>
      %c2_i32_32 = arith.constant 2 : i32
      %c0_i32_33 = arith.constant 0 : i32
      %80 = vector.broadcast %c2_i32_32 : i32 to vector<1x128xi32>
      %81 = vector.broadcast %c0_i32_33 : i32 to vector<1x128xi32>
      %82 = arith.select %79, %80, %81 : vector<1x128xi1>, vector<1x128xi32>
      %83 = arith.addi %77, %82 : vector<1x128xi32>
      %c10_i32 = arith.constant 10 : i32
      %84 = vector.broadcast %c10_i32 : i32 to vector<1x128xi32>
      %85 = arith.cmpi eq, %52, %84 : vector<1x128xi32>
      %c1_i32_34 = arith.constant 1 : i32
      %c0_i32_35 = arith.constant 0 : i32
      %86 = vector.broadcast %c1_i32_34 : i32 to vector<1x128xi32>
      %87 = vector.broadcast %c0_i32_35 : i32 to vector<1x128xi32>
      %88 = arith.select %85, %86, %87 : vector<1x128xi1>, vector<1x128xi32>
      %89 = arith.addi %83, %88 : vector<1x128xi32>
      %c11_i32 = arith.constant 11 : i32
      %90 = vector.broadcast %c11_i32 : i32 to vector<1x128xi32>
      %91 = arith.cmpi eq, %52, %90 : vector<1x128xi32>
      %c2_i32_36 = arith.constant 2 : i32
      %c0_i32_37 = arith.constant 0 : i32
      %92 = vector.broadcast %c2_i32_36 : i32 to vector<1x128xi32>
      %93 = vector.broadcast %c0_i32_37 : i32 to vector<1x128xi32>
      %94 = arith.select %91, %92, %93 : vector<1x128xi1>, vector<1x128xi32>
      %95 = arith.addi %89, %94 : vector<1x128xi32>
      %c12_i32 = arith.constant 12 : i32
      %96 = vector.broadcast %c12_i32 : i32 to vector<1x128xi32>
      %97 = arith.cmpi eq, %52, %96 : vector<1x128xi32>
      %c1_i32_38 = arith.constant 1 : i32
      %c0_i32_39 = arith.constant 0 : i32
      %98 = vector.broadcast %c1_i32_38 : i32 to vector<1x128xi32>
      %99 = vector.broadcast %c0_i32_39 : i32 to vector<1x128xi32>
      %100 = arith.select %97, %98, %99 : vector<1x128xi1>, vector<1x128xi32>
      %101 = arith.addi %95, %100 : vector<1x128xi32>
      %c13_i32 = arith.constant 13 : i32
      %102 = vector.broadcast %c13_i32 : i32 to vector<1x128xi32>
      %103 = arith.cmpi eq, %52, %102 : vector<1x128xi32>
      %c2_i32_40 = arith.constant 2 : i32
      %c0_i32_41 = arith.constant 0 : i32
      %104 = vector.broadcast %c2_i32_40 : i32 to vector<1x128xi32>
      %105 = vector.broadcast %c0_i32_41 : i32 to vector<1x128xi32>
      %106 = arith.select %103, %104, %105 : vector<1x128xi1>, vector<1x128xi32>
      %107 = arith.addi %101, %106 : vector<1x128xi32>
      %c14_i32 = arith.constant 14 : i32
      %108 = vector.broadcast %c14_i32 : i32 to vector<1x128xi32>
      %109 = arith.cmpi eq, %52, %108 : vector<1x128xi32>
      %c2_i32_42 = arith.constant 2 : i32
      %c0_i32_43 = arith.constant 0 : i32
      %110 = vector.broadcast %c2_i32_42 : i32 to vector<1x128xi32>
      %111 = vector.broadcast %c0_i32_43 : i32 to vector<1x128xi32>
      %112 = arith.select %109, %110, %111 : vector<1x128xi1>, vector<1x128xi32>
      %113 = arith.addi %107, %112 : vector<1x128xi32>
      %c15_i32 = arith.constant 15 : i32
      %114 = vector.broadcast %c15_i32 : i32 to vector<1x128xi32>
      %115 = arith.cmpi eq, %52, %114 : vector<1x128xi32>
      %c3_i32_44 = arith.constant 3 : i32
      %c0_i32_45 = arith.constant 0 : i32
      %116 = vector.broadcast %c3_i32_44 : i32 to vector<1x128xi32>
      %117 = vector.broadcast %c0_i32_45 : i32 to vector<1x128xi32>
      %118 = arith.select %115, %116, %117 : vector<1x128xi1>, vector<1x128xi32>
      %119 = arith.addi %113, %118 : vector<1x128xi32>
      %c0_46 = arith.constant 0 : index
      %c0_47 = arith.constant 0 : index
      %120 = vector.load %arg4[%c0_46, %c0_47] : memref<1x128xi32, #tpu.memory_space<vmem>>, vector<1x128xi32>
      %121 = arith.muli %119, %120 : vector<1x128xi32>
      %122 = vector.shape_cast %121 : vector<1x128xi32> to vector<1x1x128xi32>
      %cst_48 = arith.constant dense<0> : vector<1xi32>
      %123 = vector.multi_reduction <add>, %122, %cst_48 [1, 2] : vector<1x1x128xi32> to vector<1xi32>
      %124 = vector.shape_cast %123 : vector<1xi32> to vector<1x1x1xi32>
      %125 = vector.extract %124[0, 0, 0] : i32 from vector<1x1x1xi32>
      %126 = tpu.iota {dimensions = array<i32: 0>} : vector<8x128xi32>
      %127 = tpu.iota {dimensions = array<i32: 1>} : vector<8x128xi32>
      %c0_i32_49 = arith.constant 0 : i32
      %128 = vector.broadcast %c0_i32_49 : i32 to vector<8x128xi32>
      %129 = arith.cmpi eq, %126, %128 : vector<8x128xi32>
      %c0_i32_50 = arith.constant 0 : i32
      %130 = vector.broadcast %c0_i32_50 : i32 to vector<8x128xi32>
      %131 = arith.cmpi eq, %127, %130 : vector<8x128xi32>
      %132 = arith.andi %129, %131 : vector<8x128xi1>
      %c0_i32_51 = arith.constant 0 : i32
      %133 = vector.broadcast %125 : i32 to vector<8x128xi32>
      %134 = vector.broadcast %c0_i32_51 : i32 to vector<8x128xi32>
      %135 = arith.select %132, %133, %134 : vector<8x128xi1>, vector<8x128xi32>
      %c0_52 = arith.constant 0 : index
      %c0_53 = arith.constant 0 : index
      %136 = vector.load %arg5[%c0_52, %c0_53] : memref<8x128xi32, #tpu.memory_space<vmem>>, vector<8x128xi32>
      tpu.vector_store %arg5[%c0_52, %c0_53], %135 {strides = array<i32>} : memref<8x128xi32, #tpu.memory_space<vmem>>, vector<8x128xi32>,
    } else {
    }
    return
  }
  func.func @transform_0(%arg0: i32, %arg1: i32) -> (i32, i32) {
    %c0_i32 = arith.constant 0 : i32
    %c0_i32_0 = arith.constant 0 : i32
    return %c0_i32, %arg1 : i32, i32
  }
  func.func @transform_1(%arg0: i32, %arg1: i32) -> (i32, i32) {
    %c0_i32 = arith.constant 0 : i32
    return %arg1, %arg0 : i32, i32
  }
  func.func @transform_2(%arg0: i32, %arg1: i32) -> (i32, i32) {
    %c0_i32 = arith.constant 0 : i32
    %c0_i32_0 = arith.constant 0 : i32
    return %c0_i32, %arg0 : i32, i32
  }
  func.func @transform_3(%arg0: i32, %arg1: i32) -> (i32, i32) {
    %c0_i32 = arith.constant 0 : i32
    %c0_i32_0 = arith.constant 0 : i32
    return %arg0, %c0_i32 : i32, i32
  }
}

</mosaic_0001>

<bundles_post_ra>
// kernel: forward.1
= control target key start
LH: loop header
LB: loop body
LE: loop exit
PB: predicated region body
PF: predicated region fallthrough
CT: control target
= control target key end

     0   :  { %8 = vsyncpa [#allocation4], 0  ;;  %s1000_s0 = inlined_call_operand.vmem [shape: f32[2,384], index: 0, kind: input, shape index: {}]   ;;  %s1001_s1 = inlined_call_operand.hbm [shape: bf16[384,384], index: 1, kind: input, shape index: {}]   ;;  %s1002_s2 = inlined_call_operand.vmem [shape: s32[1,384], index: 2, kind: input, shape index: {}]   ;;  %s1003_s3 = inlined_call_operand.vmem [shape: s32[24,128], index: 3, kind: output, shape index: {}]  }
   0x1   :  { %10 = vsyncpa [#allocation4 + $0x1], 0  ;;  %s836_s12 = smov 0   ;;  %s838_s13 = smov 0  }
   0x2   :  { %s840_s14 = smov 0   ;;  %s842_s15 = smov 0  }
   0x3   :  { %s844_s16 = smov 0   ;;  %s846_s17 = smov 0  }
   0x4   :  { %s848_s18 = smov 0   ;;  %s850_s19 = smov 0  }
   0x5 LB: > { %s557_s20 = sadd.s32 4294967295, %s803_s19   ;;  %s25_s21 = sadd.s32 1, %s795_s17  ;;  %s803_s19 = sphi %s850_s19, %s16_s19   ;;  %s799_s18 = sphi %s848_s18, %s1013_s18   ;;  %s795_s17 = sphi %s846_s17, %s1012_s17   ;;  %s791_s16 = sphi %s844_s16, %s1011_s16   ;;  %s787_s15 = sphi %s842_s15, %s1010_s15   ;;  %s783_s14 = sphi %s840_s14, %s1009_s14   ;;  %s779_s13 = sphi %s838_s13, %s1008_s13   ;;  %s775_s12 = sphi %s836_s12, %s1007_s12  }
   0x6   : > { %p26_p0 = scmp.ge.s32.totalorder %s25_s21, 3  ;;  %s28_s22 = sadd.s32 1, %s799_s18 }
   0x7   : > { %s63_s23 = sadd.s32 1, %s783_s14  ;;  %p70_p1 = scmp.ne.s32.totalorder %s783_s14, %s779_s13 }
   0x8   : > { %s1015_s21 = smov (%p26_p0, %s25_s21), 0  ;;  %s1017_s22 = smov (!%p26_p0, %s28_s22), %s799_s18 }
   0x9   : > { %s58_s24 = ssub.s32 %s795_s17, %s1015_s21  ;;  %p71_p2 = scmp.eq.s32.totalorder %s803_s19, 0 }
   0xa   : > { %p30_p3 = scmp.ge.s32.totalorder %s1017_s22, 3  ;;  %p76_p4 = scmp.ne.s32.totalorder %s779_s13, %s775_s12 }
   0xb   : > { %p887_p5 = por %p71_p2, %p70_p1  ;;  %p77_p6 = scmp.eq.s32.totalorder %s557_s20, 0 }
   0xc   : > { %s1019_s22 = smov (%p30_p3, %s1017_s22), 0  ;;  %p626_p8 = scmp.lt.s32.totalorder %s803_s19, 9 }
   0xd   : > { %p893_p7 = por %p77_p6, %p76_p4  ;;  %s59_s27 = ssub.s32 %s799_s18, %s1019_s22 }
   0xe   : > { %s60_s28 = sor.u32 %s59_s27, %s58_s24  ;;  %s159_s29 = sand.u32 1, %s783_s14  }
   0xf   : > { %p61_p9 = scmp.eq.s32.totalorder %s60_s28, 0  ;;  %s561_s30 = sshll.u32 %s159_s29, 6 }
  0x10   : > { %s613_s4 = smul.u32 48, %s795_s17  ;;  %s163_s8 = scalar_lea.vmem [#allocation3], %s561_s30 }
  0x11   : > { %s903_s5 = scalar_select %p61_p9, %s783_s14, %s63_s23  }
  0x12   : > { %s169_s6 = sadd.s32 %s799_s18, %s613_s4  ;;  %s172_s9 = sshll.u32 %s163_s8, 4  ;;  %s173_s9 = int_to_ptr.vmem [resolvable:$true] %s172_s9 }
  0x13   : > { %s564_s7 = sshll.u32 %s169_s6, 6  ;;  %p913_p10 = pnand %p626_p8, %p887_p5 }
  0x14   : > { %s171_s12 = scalar_lea.hbm %s1001_s1, %s564_s7  ;;  %p565_p11 = scmp.ge.s32.totalorder %s803_s19, 1 }
  0x15   : > { %s160_s24 = scalar_lea.sflag [#allocation4], %s159_s29  ;;  %p711_p12 = pneg %p913_p10 }
  0x16   : > { %s722_s23 = scalar_lea.vmem %s173_s9, 1024  ;;  %s805_s27 = smov [#allocation3]  }
  0x17   : > { %p723_p13 = scmp.ne.s32.totalorder %s173_s9, %s722_s23  ;;  %s727_s28 = sshll.u32 %s805_s27, 4  ;;  %s728_s28 = int_to_ptr.vmem [resolvable:$false] %s727_s28 }
  0x18   : > { %s729_s30 = scalar_lea.vmem %s728_s28, 2048  ;;  %p730_p2 = scmp.lt.s32.totalorder %s173_s9, %s728_s28 }
  0x19   : > { %p725_p0 = pnand %p723_p13, %p711_p12  ;;  %p731_p3 = scmp.lt.s32.totalorder %s729_s30, %s722_s23 }
  0x1b   : > { %p726_p1 = pneg %p725_p0  ;;  %p732_p4 = por %p731_p3, %p730_p2 }
  0x1d   : > { %p733_p5 = pnand %p732_p4, %p726_p1 }
  0x1f   : > { %736 = shalt.err (!%p733_p5)
}
  0x20   : > { %s806_s25 = smov 192   ;;  %s807_s29 = smov 64  }
  0x21   : > { %s808_s4 = smov 4   ;;  %p186_p6 = scmp.lt.s32.totalorder %s803_s19, 10 }
  0x22   : > { %625 = dma.hbm_to_vmem [thread:$0]  (!%p913_p10), %s171_s12, 1024, %s173_s9, %s160_s24, %s806_s25, %s807_s29, %s808_s4  }
  0x23   : > { %p187_p8 = pnand %p565_p11, %p186_p6 }
  0x24   : > { %s192_s6 = sand.u32 (!%p187_p8), 1, %s779_s13  }
  0x25   : > { %190 = sbr.rel (%p187_p8) target bundleno = 545 (0x221), region = 32  ;;  %s566_s7 = sshll.u32 (!%p187_p8), %s192_s6, 6 }
  0x26   : > { %s193_s8 = scalar_lea.sflag (!%p187_p8), [#allocation4], %s192_s6  ;;  %s926_s10 = scalar_lea.vmem (!%p187_p8), [#allocation3], %s566_s7 }
  0x2a   : > { %770 = dma.done.wait (%p893_p7), %s193_s8, 1024  }
  0x2b   : > { %772 = vsyncadd (%p893_p7), %s193_s8, 4294966272  ;;  %p225_p9 = scmp.lt.s32.totalorder %s787_s15, 2  ;;  %p230_p10 = scmp.lt.s32.totalorder %s791_s16, 2 }
  0x2c   : > { %p569_p7 = scmp.ne.s32.totalorder %s787_s15, 0 }
  0x2d   : > { %s226_s9 = scalar_select %p225_p9, %s787_s15, 2 }
  0x2e   : > { %s1021_s16 = smov (!%p230_p10, %s791_s16), 2  ;;  %241 = sbr.rel (%p569_p7) target bundleno = 53 (0x35), region = 40 }
  0x2f   : > { %s567_s11 = sshll.u32 %s226_s9, 1  ;;  %s232_s26 = scalar_lea.vmem %s1002_s2, %s1021_s16 }
  0x30   : > { %s228_s24 = scalar_lea.vmem %s1000_s0, %s567_s11  ;;  %s568_s28 = sshll.u32 %s1021_s16, 3 }
  0x31   : > { %s949_s29 = scalar_lea.vmem %s1003_s3, %s568_s28 }
  0x33   : > { %v809_v0 = vmov 0.0   ;;  %v810_v1 = vmov 0  }
  0x34   : > { %242 = vst [vmem:[#allocation2] sm:$0xff] %v809_v0  ;;  %243 = vst [vmem:[%s949_s29] sm:$0xff] %v810_v1 }
  0x35 PF: > { %v701_v2 = vld [vmem:[%s926_s10 + $0x38] sm:$0xff]   ;;  %v811_v3 = vmov 0.0   ;;  %v702_v4 = vld [vmem:[%s926_s10 + $0x30] sm:$0xff]   ;;  %vm812_vm0 = vmmov 0   ;;  %v703_v5 = vld [vmem:[%s926_s10 + $0x28] sm:$0xff]   ;;  %v263_v15 = vlaneseq  ;;  %p581_p11 = scmp.ne.s32.totalorder %s787_s15, 2 }
  0x36   : > { %593 = vmatprep.subr.bf16.mxu0 %v811_v3  ;;  %609 = vmatprep.mubr.msk.bf16.mxu0 %vm812_vm0, %v811_v3  ;;  %v244_v6 = vld [vmem:[%s228_s24] sm:$0x1]  ;;  %v245_v7 = vld [vmem:[%s228_s24 + $0x1] sm:$0x1]  ;;  %v704_v10 = vld [vmem:[%s926_s10 + $0x20] sm:$0xff]  }
  0x37   : > { %594 = vmatpush3.bf16.msra.mxu0 %v701_v2  ;;  %v247_v8 = vmul.f32 0.125, %v244_v6  ;;  %v254_v9 = vmul.f32 0.125, %v245_v7  ;;  %v705_v16 = vld [vmem:[%s926_s10 + $0x18] sm:$0xff]   ;;  %v959_v19 = vshrl.u32 %v263_v15, 7  ;;  %v706_v20 = vld [vmem:[%s926_s10 + $0x10] sm:$0xff]   ;;  %v707_v27 = vld [vmem:[%s926_s10 + $0x8] sm:$0xff]  }
  0x38   : > { %595 = vmatprep.subr.bf16.mxu0 %v811_v3  ;;  %v708_v30 = vld [vmem:[%s926_s10] sm:$0xff]   ;;  %v813_v31 = vmov 1.0|1.0  }
  0x39   : > { %v248_v11 = vfloor.f32 %v247_v8  ;;  %v255_v12 = vfloor.f32 %v254_v9  ;;  %v267_v26 = vsub.s32 0, %v959_v19 }
  0x3b   : > { %596 = vmatpush3.bf16.msra.mxu0 %v702_v4  ;;  %v614_v13 = vtrunc.f32 %v248_v11  ;;  %v616_v14 = vtrunc.f32 %v255_v12  ;;  %v273_v32 = vld [vmem:[#allocation2] sm:$0xff] }
  0x3c   : > { %597 = vmatprep.subr.bf16.mxu0 %v811_v3 }
  0x3d   : > { %v615_v17 = vcvt.f32.s32 %v614_v13  ;;  %v617_v18 = vcvt.f32.s32 %v616_v14 }
  0x3f   : > { %598 = vmatpush3.bf16.msra.mxu0 %v703_v5  ;;  %vm250_vm1 = vcmp.gt.s32.totalorder %v615_v17, 0  ;;  %vm257_vm2 = vcmp.gt.s32.totalorder %v617_v18, 0 }
  0x40   : > { %599 = vmatprep.subr.bf16.mxu0 %v811_v3  ;;  %v251_v21 = vsel %vm250_vm1, %v615_v17, 0  ;;  %v258_v22 = vsel %vm257_vm2, %v617_v18, 0 }
  0x41   : > { %vm252_vm3 = vcmp.lt.s32.totalorder %v251_v21, 1  ;;  %vm259_vm4 = vcmp.lt.s32.totalorder %v258_v22, 1 }
  0x42   : > { %v253_v23 = vsel %vm252_vm3, %v251_v21, 1  ;;  %v260_v24 = vsel %vm259_vm4, %v258_v22, 1 }
  0x43   : > { %600 = vmatpush3.bf16.msra.mxu0 %v704_v10  ;;  %v261_v25 = vmul.u32 2, %v253_v23 }
  0x44   : > { %601 = vmatprep.subr.bf16.mxu0 %v811_v3 }
  0x45   : > { %v262_v28 = vadd.s32 %v261_v25, %v260_v24 }
  0x47   : > { %602 = vmatpush3.bf16.msra.mxu0 %v705_v16  ;;  %v268_v29 = vrot.slane %v262_v28, %v267_v26 }
  0x48   : > { %603 = vmatprep.subr.bf16.mxu0 %v811_v3 }
  0x49   : > { %vm269_vm5 = vcmp.eq.s32.totalorder %v268_v29, %v959_v19 }
  0x4a   : > { %vm579_vm6 = vmpackc.low %vm269_vm5, %vm269_vm5 }
  0x4b   : > { %604 = vmatpush3.bf16.msra.mxu0 %v706_v20 }
  0x4c   : > { %605 = vmatprep.subr.bf16.mxu0 %v811_v3 }
  0x4f   : > { %606 = vmatpush3.bf16.msra.mxu0 %v707_v27 }
  0x50   : > { %607 = vmatprep.subr.bf16.mxu0 %v811_v3 }
  0x53   : > { %608 = vmatpush3.bf16.msra.mxu0 %v708_v30 }
  0x56   : > { %610 = vmatmul.mubr.msk.bf16.vlgmr.msra.gmra.mxu0 %vm579_vm6, %v813_v31 }
 0x116   : > { %v372_v33 = vpop.f32.mrf.mxu0 }
 0x117   : > { %v378_v34 = vadd.f32 %v372_v33, %v273_v32 }
 0x118   : > { %v611_v35 = vpop.f32.mrf.mxu0  ;;  %383 = sbr.rel (%p581_p11) target bundleno = 545 (0x221), region = 44 }
 0x119   : > { %379 = vst [vmem:[#allocation2] sm:$0xff] %v378_v34 }
 0x11a   : > { %v375_v36 = vpop.f32.mrf.mxu0 }
 0x11c   : > { %v612_v37 = vpop.f32.mrf.mxu0 }
 0x11d   : > { %v814_v39 = vmov 1   ;;  %v815_v41 = vmov 0   ;;  %v427_v6 = vld [vmem:[%s232_s26] sm:$0x1]  ;;  %vm429_vm3 = vcmask 1040384   ;;  %v451_v28 = vand.u32 127, %v263_v15 }
 0x11e   : > { %v387_v40 = vshll.u32 %v814_v39, %v959_v19  ;;  %vm452_vm4 = vcmp.eq.s32.totalorder %v959_v19, 0 }
 0x11f   : > { %vm453_vm5 = vcmp.eq.s32.totalorder %v451_v28, 0 }
 0x120   : > { %v384_v38 = vld [vmem:[#allocation2] sm:$0xff]  ;;  %vm454_vm6 = vmand %vm452_vm4, %vm453_vm5 }
 0x121   : > { %vm385_vm7 = vcmp.gt.f32.partialorder %v384_v38, 0.5 }
 0x122   : > { %v386_v42 = vsel %vm385_vm7, 1, %v815_v41 }
 0x123   : > { %v388_v43 = vmul.u32 %v387_v40, %v386_v42 }
 0x125   : > { %v389_v44 = vrot.slane %v388_v43, 4 }
 0x127   : > { %v390_v45 = vadd.s32 %v389_v44, %v388_v43 }
 0x129   : > { %v391_v46 = vrot.slane %v390_v45, 2 }
 0x12b   : > { %v392_v47 = vadd.s32 %v391_v46, %v390_v45 }
 0x12d   : > { %v393_v48 = vrot.slane %v392_v47, 1 }
 0x12f   : > { %v394_v49 = vadd.s32 %v393_v48, %v392_v47 }
 0x131   : > { %vm395_vm8 = vcmp.eq.s32.totalorder %v394_v49, 3  ;;  %vm397_vm9 = vcmp.eq.s32.totalorder %v394_v49, 5  ;;  %vm400_vm10 = vcmp.eq.s32.totalorder %v394_v49, 6  ;;  %vm403_vm11 = vcmp.eq.s32.totalorder %v394_v49, 7 }
 0x132   : > { %v396_v50 = vsel %vm395_vm8, 1, %v815_v41  ;;  %v398_v51 = vsel %vm397_vm9, 1, %v815_v41  ;;  %v401_v52 = vsel %vm400_vm10, 2, %v815_v41  ;;  %vm406_vm12 = vcmp.eq.s32.totalorder %v394_v49, 9 }
 0x133   : > { %v399_v53 = vadd.s32 %v398_v51, %v396_v50  ;;  %v404_v54 = vsel %vm403_vm11, 2, %v815_v41  ;;  %vm409_vm13 = vcmp.eq.s32.totalorder %v394_v49, 10  ;;  %v407_v56 = vsel %vm406_vm12, 2, %v815_v41 }
 0x134   : > { %vm412_vm14 = vcmp.eq.s32.totalorder %v394_v49, 11  ;;  %v410_v58 = vsel %vm409_vm13, 1, %v815_v41  ;;  %vm415_vm15 = vcmp.eq.s32.totalorder %v394_v49, 12  ;;  %vm418_vm0 = vcmp.eq.s32.totalorder %v394_v49, 13 }
 0x135   : > { %v402_v55 = vadd.s32 %v401_v52, %v399_v53  ;;  %v413_v60 = vsel %vm412_vm14, 2, %v815_v41  ;;  %v416_v62 = vsel %vm415_vm15, 1, %v815_v41  ;;  %vm421_vm1 = vcmp.eq.s32.totalorder %v394_v49, 14 }
 0x136   : > { %v419_v0 = vsel %vm418_vm0, 2, %v815_v41  ;;  %vm424_vm2 = vcmp.eq.s32.totalorder %v394_v49, 15  ;;  %v422_v2 = vsel %vm421_vm1, 2, %v815_v41 }
 0x137   : > { %v405_v57 = vadd.s32 %v404_v54, %v402_v55  ;;  %v425_v4 = vsel %vm424_vm2, 3, %v815_v41 }
 0x139   : > { %v408_v59 = vadd.s32 %v407_v56, %v405_v57 }
 0x13b   : > { %v411_v61 = vadd.s32 %v410_v58, %v408_v59 }
 0x13d   : > { %v414_v63 = vadd.s32 %v413_v60, %v411_v61 }
 0x13f   : > { %v417_v1 = vadd.s32 %v416_v62, %v414_v63 }
 0x141   : > { %v420_v3 = vadd.s32 %v419_v0, %v417_v1 }
 0x143   : > { %v423_v5 = vadd.s32 %v422_v2, %v420_v3 }
 0x145   : > { %v426_v7 = vadd.s32 %v425_v4, %v423_v5 }
 0x147   : > { %v428_v8 = vmul.u32 %v427_v6, %v426_v7 }
 0x149   : > { %v430_v9 = vsel %vm429_vm3, %v428_v8, 0 }
 0x14a   : > { %v432_v10 = vshrl.u32 %v430_v9, 16  ;;  %v431_v11 = vand.u32 65535, %v430_v9 }
 0x14c   : > { %v434_v12 = vcvt.s32.f32 %v432_v10  ;;  %v433_v13 = vcvt.s32.f32 %v431_v11 }
 0x14e   : > { %437 = vadd.xlane.f32.xlu0 %v434_v12 }
 0x152   : > { %435 = vadd.xlane.f32.xlu0 %v433_v13 }
 0x1d7   : > { %v438_v14 = vpop.xlane.xlu0 %437 }
 0x1d8   : > { %v440_v16 = vcvt.f32.s32 %v438_v14 }
 0x1da   : > { %v441_v18 = vshll.u32 %v440_v16, 16 }
 0x1db   : > { %v436_v17 = vpop.xlane.xlu0 %435 }
 0x1dc   : > { %v439_v20 = vcvt.f32.s32 %v436_v17 }
 0x1de   : > { %v442_v21 = vadd.s32 %v441_v18, %v439_v20 }
 0x1e0   : > { %v443_v22 = vrot.slane %v442_v21, 4 }
 0x1e2   : > { %v444_v23 = vadd.s32 %v443_v22, %v442_v21 }
 0x1e4   : > { %v445_v24 = vrot.slane %v444_v23, 2 }
 0x1e6   : > { %v446_v25 = vadd.s32 %v445_v24, %v444_v23 }
 0x1e8   : > { %v447_v26 = vrot.slane %v446_v25, 1 }
 0x1ea   : > { %v448_v27 = vadd.s32 %v447_v26, %v446_v25 }
 0x1ec   : > { %618 = vpush %v448_v27 }
 0x21d   : > { %s619_s16 = spop %618 }
 0x21e   : > { %v455_v29 = vstv %s619_s16 }
 0x21f   : > { %v456_v30 = vsel %vm454_vm6, %v455_v29, 0 }
 0x220   : > { %457 = vst [vmem:[%s949_s29] sm:$0xff] %v456_v30 }
 0x221 PF: > { %s16_s19 = sadd.s32 1, %s803_s19   ;;  %s1007_s12 = smov %s779_s13 }
 0x222   : > { %p13_p12 = scmp.ge.s32.totalorder %s16_s19, 11   ;;  %s1008_s13 = smov %s783_s14 }
 0x223   : > { %s1009_s14 = smov %s903_s5  ;;  %s1010_s15 = smov %s795_s17 }
 0x224   : > { %s1011_s16 = smov %s799_s18  ;;  %s1012_s17 = smov %s1015_s21 }
 0x225   : > { %s1013_s18 = smov %s1019_s22  ;;  %15 = sbr.rel (!%p13_p12) target bundleno = 5 (0x5), region = 86 }
 0x22a   :  { %477 = vsyncpa [#allocation4], 1 }
 0x22b   :  { %479 = vsyncpa [#allocation4 + $0x1], 1 }

</bundles_post_ra>
